<compile_context>
chip_gen: v7x
topology: tpu7x:2x2x1
jax: 0.10.0
libtpu: 0.0.40
codegen_flags: <defaults>
</compile_context>

<pallas_src>
import functools

import jax
import jax.numpy as jnp
from jax.experimental import pallas as pl
from jax.experimental.pallas import tpu as pltpu


# ----------------------------------------------------------------------------
# Parameter initialization (deterministic, mimics xavier_normal_ + zero bias)
# ----------------------------------------------------------------------------
def _xavier_normal(key, fan_in, fan_out):
    std = (2.0 / (fan_in + fan_out)) ** 0.5
    return jax.random.normal(key, (fan_in, fan_out), jnp.float32) * std


def init_params(key, input_dim, nf_particle, nf_effect, g_dim, u_dim, n_chan):
    ks = jax.random.split(key, 9)
    H1, H2 = nf_particle, nf_effect
    p = {}
    # Embedding: Linear(sd,H1)-ReLU-Linear(H1,H1)-ReLU-Linear(H1,H1)-ReLU-Linear(H1, g*c+1)
    p["e_w0"] = _xavier_normal(ks[0], input_dim, H1)
    p["e_b0"] = jnp.zeros((1, H1), jnp.float32)
    p["e_w1"] = _xavier_normal(ks[1], H1, H1)
    p["e_b1"] = jnp.zeros((1, H1), jnp.float32)
    p["e_w2"] = _xavier_normal(ks[2], H1, H1)
    p["e_b2"] = jnp.zeros((1, H1), jnp.float32)
    p["e_w3"] = _xavier_normal(ks[3], H1, g_dim * n_chan + 1)
    p["e_b3"] = jnp.zeros((1, g_dim * n_chan + 1), jnp.float32)
    # U_Embedding.model_u: Linear(sd, H2//2)-ReLU-Linear(H2//2, 1)
    p["u_w0"] = _xavier_normal(ks[4], input_dim, H2 // 2)
    p["u_b0"] = jnp.zeros((1, H2 // 2), jnp.float32)
    p["u_w1"] = _xavier_normal(ks[5], H2 // 2, 1)
    p["u_b1"] = jnp.zeros((1, 1), jnp.float32)
    # U_Embedding.model: Linear(sd,H2)-ReLU-Linear(H2,H2)-ReLU-Linear(H2, u_dim*c)
    p["v_w0"] = _xavier_normal(ks[6], input_dim, H2)
    p["v_b0"] = jnp.zeros((1, H2), jnp.float32)
    p["v_w1"] = _xavier_normal(ks[7], H2, H2)
    p["v_b1"] = jnp.zeros((1, H2), jnp.float32)
    p["v_w2"] = _xavier_normal(ks[8], H2, u_dim * n_chan)
    p["v_b2"] = jnp.zeros((1, u_dim * n_chan), jnp.float32)
    return p


# ----------------------------------------------------------------------------
# Weight packing: 18 per-layer tensors -> 10 fused/block-diagonal arrays.
# Zero rows / zero columns keep the math bit-exact vs. the unfused layers.
# ----------------------------------------------------------------------------
def _pack_params(p, emb_dim, uenc_dim, out_w):
    H1 = p["e_w0"].shape[1]           # Embedding hidden (nf_particle)
    H2 = p["v_w0"].shape[1]           # U_Embedding hidden (nf_effect)
    Hu = p["u_w0"].shape[1]           # nf_effect // 2
    D1 = H1 + H2 + Hu
    f32 = jnp.float32

    # Layer 1 (all three MLPs consume x): columns laid out as [e | v | u].
    w1 = jnp.concatenate([p["e_w0"], p["v_w0"], p["u_w0"]], axis=1)
    b1 = jnp.concatenate([p["e_b0"], p["v_b0"], p["u_b0"]], axis=1)

    # Layer 2: block-diagonal [Embedding L2 | U_Embedding.model L2]; the u-path
    # rows are zero (its hidden is carried forward untouched via h1).
    w2 = jnp.zeros((D1, H1 + H2), f32)
    w2 = w2.at[:H1, :H1].set(p["e_w1"]).at[H1:H1 + H2, H1:].set(p["v_w1"])
    b2 = jnp.concatenate([p["e_b1"], p["v_b1"]], axis=1)

    # Layer 3: Embedding L3 only; v-path rows are zero.
    w3 = jnp.zeros((H1 + H2, H1), f32).at[:H1, :].set(p["e_w2"])
    b3 = p["e_b2"]

    # Fused heads -> one lane-dense [*, out_w] slab:
    #   cols [0, emb_dim)                    : Embedding head  (from h3)
    #   col  emb_dim                         : u_logit head    (from h1 u-slice)
    #   cols [emb_dim+1, emb_dim+1+uenc_dim) : u_enc head      (from h2 v-slice)
    w4a = jnp.zeros((H1, out_w), f32).at[:, :emb_dim].set(p["e_w3"])
    w4b = jnp.zeros((H1 + H2, out_w), f32).at[
        H1:, emb_dim + 1:emb_dim + 1 + uenc_dim].set(p["v_w2"])
    w4c = jnp.zeros((D1, out_w), f32).at[
        H1 + H2:, emb_dim:emb_dim + 1].set(p["u_w1"])
    b4 = jnp.zeros((1, out_w), f32)
    b4 = (b4.at[:, :emb_dim].set(p["e_b3"])
             .at[:, emb_dim:emb_dim + 1].set(p["u_b1"])
             .at[:, emb_dim + 1:emb_dim + 1 + uenc_dim].set(p["v_b2"]))
    return (w1, b1, w2, b2, w3, b3, w4a, w4b, w4c, b4)


# ----------------------------------------------------------------------------
# Fused MLP Pallas kernel: one row-tile of x -> one lane-dense output slab
# ----------------------------------------------------------------------------
def _encoder_fused_kernel(x_ref, w1, b1, w2, b2, w3, b3, w4a, w4b, w4c, b4,
                          out_ref, *, emb_dim, uenc_dim):
    x = x_ref[...]
    # Layer 1 (fused first layers): h1 = [h_e | h_v | h_u]
    h1 = jnp.maximum(
        jnp.dot(x, w1[...], preferred_element_type=jnp.float32) + b1[...], 0.0)
    # Layer 2 (block-diagonal): h2 = [h2_e | h2_v]
    h2 = jnp.maximum(
        jnp.dot(h1, w2[...], preferred_element_type=jnp.float32) + b2[...], 0.0)
    # Layer 3 (Embedding path only): h3 = h3_e
    h3 = jnp.maximum(
        jnp.dot(h2, w3[...], preferred_element_type=jnp.float32) + b3[...], 0.0)
    # Fused heads -> single 128-wide (lane-dense) output tile.
    out = (jnp.dot(h3, w4a[...], preferred_element_type=jnp.float32)
           + jnp.dot(h2, w4b[...], preferred_element_type=jnp.float32)
           + jnp.dot(h1, w4c[...], preferred_element_type=jnp.float32)
           + b4[...])
    # tanh only needs to land on the u_enc lanes; select via lane iota.
    lane = jax.lax.broadcasted_iota(jnp.int32, out.shape, 1)
    tanh_lanes = (lane >= emb_dim + 1) & (lane < emb_dim + 1 + uenc_dim)
    out_ref[...] = jnp.where(tanh_lanes, jnp.tanh(out), out)


def encoder_mlp(x, params, g_dim, u_dim, n_chan, *, tm=1024):
    """x: [M, sd] f32 -> (emb [M, g*c+1], u_logit [M, 1], u_enc [M, u*c])."""
    M, sd = x.shape
    emb_dim = g_dim * n_chan + 1
    uenc_dim = u_dim * n_chan
    payload = emb_dim + 1 + uenc_dim
    out_w = 128 * ((payload + 127) // 128)      # lane-dense output width

    packed = _pack_params(params, emb_dim, uenc_dim, out_w)

    # Large row tile to amortize the ~0.35us/step pipeline overhead; 8-aligned
    # and clamped so small inputs become a single full block.  At tm=1024 the
    # double-buffered x + out blocks are ~1.2 MB -> safe on v5e/v6e/v7x VMEM,
    # and realistic M still yields >=2 grid steps (so v7x's 2 TCs both work).
    tm_eff = min(tm, ((M + 7) // 8) * 8)
    pad = (-M) % tm_eff
    if pad:                                     # tail rows only (< tm_eff)
        x = jnp.pad(x, ((0, pad), (0, 0)))
    Mp = M + pad

    kernel = functools.partial(_encoder_fused_kernel,
                               emb_dim=emb_dim, uenc_dim=uenc_dim)

    def const_spec(arr):                        # whole array, fetched once
        return pl.BlockSpec(arr.shape, lambda i: (0, 0))

    out = pl.pallas_call(
        kernel,
        out_shape=jax.ShapeDtypeStruct((Mp, out_w), jnp.float32),
        grid_spec=pltpu.PrefetchScalarGridSpec(
            num_scalar_prefetch=0,
            grid=(Mp // tm_eff,),
            in_specs=[pl.BlockSpec((tm_eff, sd), lambda i: (i, 0))]
                     + [const_spec(w) for w in packed],
            out_specs=pl.BlockSpec((tm_eff, out_w), lambda i: (i, 0)),
        ),
        compiler_params=pltpu.CompilerParams(
            dimension_semantics=("parallel",)),
    )(x, *packed)

    emb = out[:M, :emb_dim]
    ulog = out[:M, emb_dim:emb_dim + 1]
    uenc = out[:M, emb_dim + 1:emb_dim + 1 + uenc_dim]
    return emb, ulog, uenc


# ----------------------------------------------------------------------------
# EncoderNetwork forward (default path: with_interactions=False, with_u=True)
# ----------------------------------------------------------------------------
def encoder_network_forward(states, temp, params, *, g_dim, u_dim, n_chan,
                            tm=1024):
    B, N, T, sd = states.shape
    # The MLPs are purely row-wise, so the module's states.permute(0,2,1,3) and
    # the inverse permutes on every output cancel exactly: feed rows in
    # (b, n, t) order and reshape outputs straight to (B, N, T, ...).
    x = states.reshape(B * N * T, sd).astype(jnp.float32)
    emb, ulog, uenc = encoder_mlp(x, params, g_dim, u_dim, n_chan, tm=tm)

    selector = emb[:, :1].reshape(B, N, T, 1)                 # g_sel_logits
    obs = emb[:, 1:].reshape(B, N, T, n_chan, g_dim)          # g
    u_logits = ulog.reshape(B, N, T, 1)
    g_u = uenc.reshape(B, N, T, n_chan, u_dim)
    # NOTE: u = sigmoid(u_logits / temp) in the torch module is dead compute
    # (unconditionally overwritten since inputs=None and g_u is not None).
    del temp
    # Exact reproduction of the module's
    #   u = g_u.reshape(B,T,N,-1).permute(0,2,1,3).reshape(B,N,T,-1)
    # which genuinely scrambles data (g_u is already (B,N,T,...)), so this one
    # transpose must stay to preserve semantics.
    u = jnp.transpose(g_u.reshape(B, T, N, n_chan * u_dim), (0, 2, 1, 3))

    sel, sel_logits = None, None   # with_interactions=False
    # TODO(synk): with_interactions=True branch (Rel_Embedding + STGumbelSigmoid)
    # not implemented — depends on the unavailable `tut` gumbel utilities.
    return obs, g_u, (u, u_logits), (sel, sel_logits), selector


# ----------------------------------------------------------------------------
# Pure-JAX references (correctness sanity checks)
# ----------------------------------------------------------------------------
def _mlp_reference(x, p):
    relu = lambda a: jnp.maximum(a, 0.0)
    h = relu(x @ p["e_w0"] + p["e_b0"])
    h = relu(h @ p["e_w1"] + p["e_b1"])
    h = relu(h @ p["e_w2"] + p["e_b2"])
    emb = h @ p["e_w3"] + p["e_b3"]
    hu = relu(x @ p["u_w0"] + p["u_b0"])
    ulog = hu @ p["u_w1"] + p["u_b1"]
    hv = relu(x @ p["v_w0"] + p["v_b0"])
    hv = relu(hv @ p["v_w1"] + p["v_b1"])
    uenc = jnp.tanh(hv @ p["v_w2"] + p["v_b2"])
    return emb, ulog, uenc


def _forward_reference(states, params, g_dim, u_dim, n_chan):
    """Follows the exact torch permute/reshape order (validates their removal)."""
    B, N, T, sd = states.shape
    BT = B * T
    st = jnp.transpose(states, (0, 2, 1, 3)).reshape(BT * N, sd)
    emb, ulog, uenc = _mlp_reference(st, params)
    g_sel_logits = emb[:, :1].reshape(BT, N, 1)
    g = emb[:, 1:].reshape(BT * N, n_chan, g_dim)
    u_logits = ulog.reshape(BT, N, 1)
    g_u = uenc.reshape(BT * N, n_chan, u_dim)

    obs = jnp.transpose(g.reshape(B, T, N, n_chan, g_dim),
                        (0, 2, 1, 3, 4)).reshape(B, N, T, n_chan, g_dim)
    g_u2 = jnp.transpose(g_u.reshape(B, T, N, n_chan, u_dim),
                         (0, 2, 1, 3, 4)).reshape(B, N, T, n_chan, u_dim)
    u = jnp.transpose(g_u2.reshape(B, T, N, n_chan * u_dim),
                      (0, 2, 1, 3)).reshape(B, N, T, n_chan * u_dim)
    u_logits2 = jnp.transpose(u_logits.reshape(B, T, N, 1),
                              (0, 2, 1, 3)).reshape(B, N, T, 1)
    selector = jnp.transpose(g_sel_logits.reshape(B, T, N, 1),
                             (0, 2, 1, 3)).reshape(B, N, T, 1)
    return obs, g_u2, u, u_logits2, selector


if __name__ == "__main__":
    # Small, module-consistent shapes.
    B, N, T, sd = 2, 4, 3, 8          # states: [B, N, T, input_dim]
    nf_particle, nf_effect = 32, 32
    g_dim, r_dim, u_dim, n_chan = 8, 8, 4, 2
    temp = 1.0

    key = jax.random.PRNGKey(0)
    k_states, k_params = jax.random.split(key)
    states = jax.random.normal(k_states, (B, N, T, sd), jnp.float32)
    params = init_params(k_params, sd, nf_particle, nf_effect,
                         g_dim, u_dim, n_chan)

    fwd = jax.jit(functools.partial(
        encoder_network_forward, g_dim=g_dim, u_dim=u_dim, n_chan=n_chan))
    obs, g_u, (u, u_logits), (sel, sel_logits), selector = fwd(
        states, temp, params)
    jax.block_until_ready((obs, g_u, u, u_logits, selector))

    # 1) fused + packed Pallas MLP vs plain per-layer JAX reference
    x_flat = states.reshape(B * N * T, sd)
    emb_k, ulog_k, uenc_k = encoder_mlp(x_flat, params, g_dim, u_dim, n_chan)
    emb_r, ulog_r, uenc_r = _mlp_reference(x_flat, params)
    assert jnp.allclose(emb_k, emb_r, atol=1e-4, rtol=1e-4)
    assert jnp.allclose(ulog_k, ulog_r, atol=1e-4, rtol=1e-4)
    assert jnp.allclose(uenc_k, uenc_r, atol=1e-4, rtol=1e-4)

    # 2) end-to-end vs a reference that follows the torch permute/reshape order
    obs_r, g_u_r, u_r, u_logits_r, selector_r = _forward_reference(
        states, params, g_dim, u_dim, n_chan)
    assert jnp.allclose(obs, obs_r, atol=1e-4, rtol=1e-4)
    assert jnp.allclose(g_u, g_u_r, atol=1e-4, rtol=1e-4)
    assert jnp.allclose(u, u_r, atol=1e-4, rtol=1e-4)
    assert jnp.allclose(u_logits, u_logits_r, atol=1e-4, rtol=1e-4)
    assert jnp.allclose(selector, selector_r, atol=1e-4, rtol=1e-4)

    assert obs.shape == (B, N, T, n_chan, g_dim)
    assert g_u.shape == (B, N, T, n_chan, u_dim)
    assert u.shape == (B, N, T, n_chan * u_dim)
    assert u_logits.shape == (B, N, T, 1)
    assert selector.shape == (B, N, T, 1)
    assert sel is None and sel_logits is None

    print("KERNEL_OK")
</pallas_src>

<mosaic_0001>
module attributes {stable_mosaic.version = 11 : i64} {
  func.func @_encoder_fused_kernel(%arg0: i32, %arg1: memref<24x8xf32, #tpu.memory_space<vmem>>, %arg2: memref<8x80xf32, #tpu.memory_space<vmem>>, %arg3: memref<1x80xf32, #tpu.memory_space<vmem>>, %arg4: memref<80x64xf32, #tpu.memory_space<vmem>>, %arg5: memref<1x64xf32, #tpu.memory_space<vmem>>, %arg6: memref<64x32xf32, #tpu.memory_space<vmem>>, %arg7: memref<1x32xf32, #tpu.memory_space<vmem>>, %arg8: memref<32x128xf32, #tpu.memory_space<vmem>>, %arg9: memref<64x128xf32, #tpu.memory_space<vmem>>, %arg10: memref<80x128xf32, #tpu.memory_space<vmem>>, %arg11: memref<1x128xf32, #tpu.memory_space<vmem>>, %arg12: memref<24x128xf32, #tpu.memory_space<vmem>>) attributes {dimension_semantics = [#tpu.dimension_semantics<parallel>], iteration_bounds = array<i64: 1>, scalar_prefetch = 0 : i64, scratch_operands = 0 : i64, tpu.core_type = #tpu.core_type<tc>, window_params = [{transform_indices = @transform_0, window_bounds = array<i64: 24, 8>}, {pipeline_mode = #tpu.pipeline_mode<synchronous>, transform_indices = @transform_1, window_bounds = array<i64: 8, 80>}, {pipeline_mode = #tpu.pipeline_mode<synchronous>, transform_indices = @transform_2, window_bounds = array<i64: 1, 80>}, {pipeline_mode = #tpu.pipeline_mode<synchronous>, transform_indices = @transform_3, window_bounds = array<i64: 80, 64>}, {pipeline_mode = #tpu.pipeline_mode<synchronous>, transform_indices = @transform_4, window_bounds = array<i64: 1, 64>}, {pipeline_mode = #tpu.pipeline_mode<synchronous>, transform_indices = @transform_5, window_bounds = array<i64: 64, 32>}, {pipeline_mode = #tpu.pipeline_mode<synchronous>, transform_indices = @transform_6, window_bounds = array<i64: 1, 32>}, {pipeline_mode = #tpu.pipeline_mode<synchronous>, transform_indices = @transform_7, window_bounds = array<i64: 32, 128>}, {pipeline_mode = #tpu.pipeline_mode<synchronous>, transform_indices = @transform_8, window_bounds = array<i64: 64, 128>}, {pipeline_mode = #tpu.pipeline_mode<synchronous>, transform_indices = @transform_9, window_bounds = array<i64: 80, 128>}, {pipeline_mode = #tpu.pipeline_mode<synchronous>, transform_indices = @transform_10, window_bounds = array<i64: 1, 128>}, {transform_indices = @transform_11, window_bounds = array<i64: 24, 128>}]} {
    %c0 = arith.constant 0 : index
    %c0_0 = arith.constant 0 : index
    %0 = vector.load %arg1[%c0, %c0_0] : memref<24x8xf32, #tpu.memory_space<vmem>>, vector<24x8xf32>
    %c0_1 = arith.constant 0 : index
    %c0_2 = arith.constant 0 : index
    %1 = vector.load %arg2[%c0_1, %c0_2] : memref<8x80xf32, #tpu.memory_space<vmem>>, vector<8x80xf32>
    %cst = arith.constant dense<0.000000e+00> : vector<24x80xf32>
    %2 = tpu.matmul %0, %1, %cst {dimension_numbers = #tpu.dot_dimension_numbers<[1], [0], [0], [1], [0, 0, 1, 1], [], []>} : vector<24x8xf32>, vector<8x80xf32>, vector<24x80xf32> -> vector<24x80xf32>
    %c0_3 = arith.constant 0 : index
    %c0_4 = arith.constant 0 : index
    %3 = vector.load %arg3[%c0_3, %c0_4] : memref<1x80xf32, #tpu.memory_space<vmem>>, vector<1x80xf32>
    %4 = vector.broadcast %3 : vector<1x80xf32> to vector<24x80xf32>
    %5 = arith.addf %2, %4 : vector<24x80xf32>
    %cst_5 = arith.constant 0.000000e+00 : f32
    %6 = vector.broadcast %cst_5 : f32 to vector<24x80xf32>
    %7 = arith.maximumf %5, %6 : vector<24x80xf32>
    %c0_6 = arith.constant 0 : index
    %c0_7 = arith.constant 0 : index
    %8 = vector.load %arg4[%c0_6, %c0_7] : memref<80x64xf32, #tpu.memory_space<vmem>>, vector<80x64xf32>
    %cst_8 = arith.constant dense<0.000000e+00> : vector<24x64xf32>
    %9 = tpu.matmul %7, %8, %cst_8 {dimension_numbers = #tpu.dot_dimension_numbers<[1], [0], [0], [1], [0, 0, 1, 1], [], []>} : vector<24x80xf32>, vector<80x64xf32>, vector<24x64xf32> -> vector<24x64xf32>
    %c0_9 = arith.constant 0 : index
    %c0_10 = arith.constant 0 : index
    %10 = vector.load %arg5[%c0_9, %c0_10] : memref<1x64xf32, #tpu.memory_space<vmem>>, vector<1x64xf32>
    %11 = vector.broadcast %10 : vector<1x64xf32> to vector<24x64xf32>
    %12 = arith.addf %9, %11 : vector<24x64xf32>
    %cst_11 = arith.constant 0.000000e+00 : f32
    %13 = vector.broadcast %cst_11 : f32 to vector<24x64xf32>
    %14 = arith.maximumf %12, %13 : vector<24x64xf32>
    %c0_12 = arith.constant 0 : index
    %c0_13 = arith.constant 0 : index
    %15 = vector.load %arg6[%c0_12, %c0_13] : memref<64x32xf32, #tpu.memory_space<vmem>>, vector<64x32xf32>
    %cst_14 = arith.constant dense<0.000000e+00> : vector<24x32xf32>
    %16 = tpu.matmul %14, %15, %cst_14 {dimension_numbers = #tpu.dot_dimension_numbers<[1], [0], [0], [1], [0, 0, 1, 1], [], []>} : vector<24x64xf32>, vector<64x32xf32>, vector<24x32xf32> -> vector<24x32xf32>
    %c0_15 = arith.constant 0 : index
    %c0_16 = arith.constant 0 : index
    %17 = vector.load %arg7[%c0_15, %c0_16] : memref<1x32xf32, #tpu.memory_space<vmem>>, vector<1x32xf32>
    %18 = vector.broadcast %17 : vector<1x32xf32> to vector<24x32xf32>
    %19 = arith.addf %16, %18 : vector<24x32xf32>
    %cst_17 = arith.constant 0.000000e+00 : f32
    %20 = vector.broadcast %cst_17 : f32 to vector<24x32xf32>
    %21 = arith.maximumf %19, %20 : vector<24x32xf32>
    %c0_18 = arith.constant 0 : index
    %c0_19 = arith.constant 0 : index
    %22 = vector.load %arg8[%c0_18, %c0_19] : memref<32x128xf32, #tpu.memory_space<vmem>>, vector<32x128xf32>
    %cst_20 = arith.constant dense<0.000000e+00> : vector<24x128xf32>
    %23 = tpu.matmul %21, %22, %cst_20 {dimension_numbers = #tpu.dot_dimension_numbers<[1], [0], [0], [1], [0, 0, 1, 1], [], []>} : vector<24x32xf32>, vector<32x128xf32>, vector<24x128xf32> -> vector<24x128xf32>
    %c0_21 = arith.constant 0 : index
    %c0_22 = arith.constant 0 : index
    %24 = vector.load %arg9[%c0_21, %c0_22] : memref<64x128xf32, #tpu.memory_space<vmem>>, vector<64x128xf32>
    %cst_23 = arith.constant dense<0.000000e+00> : vector<24x128xf32>
    %25 = tpu.matmul %14, %24, %cst_23 {dimension_numbers = #tpu.dot_dimension_numbers<[1], [0], [0], [1], [0, 0, 1, 1], [], []>} : vector<24x64xf32>, vector<64x128xf32>, vector<24x128xf32> -> vector<24x128xf32>
    %26 = arith.addf %23, %25 : vector<24x128xf32>
    %c0_24 = arith.constant 0 : index
    %c0_25 = arith.constant 0 : index
    %27 = vector.load %arg10[%c0_24, %c0_25] : memref<80x128xf32, #tpu.memory_space<vmem>>, vector<80x128xf32>
    %cst_26 = arith.constant dense<0.000000e+00> : vector<24x128xf32>
    %28 = tpu.matmul %7, %27, %cst_26 {dimension_numbers = #tpu.dot_dimension_numbers<[1], [0], [0], [1], [0, 0, 1, 1], [], []>} : vector<24x80xf32>, vector<80x128xf32>, vector<24x128xf32> -> vector<24x128xf32>
    %29 = arith.addf %26, %28 : vector<24x128xf32>
    %c0_27 = arith.constant 0 : index
    %c0_28 = arith.constant 0 : index
    %30 = vector.load %arg11[%c0_27, %c0_28] : memref<1x128xf32, #tpu.memory_space<vmem>>, vector<1x128xf32>
    %31 = vector.broadcast %30 : vector<1x128xf32> to vector<24x128xf32>
    %32 = arith.addf %29, %31 : vector<24x128xf32>
    %33 = tpu.iota {dimensions = array<i32: 1>} : vector<24x128xi32>
    %c18_i32 = arith.constant 18 : i32
    %34 = vector.broadcast %c18_i32 : i32 to vector<24x128xi32>
    %35 = arith.cmpi sge, %33, %34 : vector<24x128xi32>
    %c26_i32 = arith.constant 26 : i32
    %36 = vector.broadcast %c26_i32 : i32 to vector<24x128xi32>
    %37 = arith.cmpi slt, %33, %36 : vector<24x128xi32>
    %38 = arith.andi %35, %37 : vector<24x128xi1>
    %39 = math.tanh %32 : vector<24x128xf32>
    %40 = arith.select %38, %39, %32 : vector<24x128xi1>, vector<24x128xf32>
    %c0_29 = arith.constant 0 : index
    %c0_30 = arith.constant 0 : index
    %41 = vector.load %arg12[%c0_29, %c0_30] : memref<24x128xf32, #tpu.memory_space<vmem>>, vector<24x128xf32>
    tpu.vector_store %arg12[%c0_29, %c0_30], %40 {strides = array<i32>} : memref<24x128xf32, #tpu.memory_space<vmem>>, vector<24x128xf32>,
    return
  }
  func.func @transform_0(%arg0: i32) -> (i32, i32) {
    %c0_i32 = arith.constant 0 : i32
    %c0_i32_0 = arith.constant 0 : i32
    return %arg0, %c0_i32 : i32, i32
  }
  func.func @transform_1(%arg0: i32) -> (i32, i32) {
    %c0_i32 = arith.constant 0 : i32
    %c0_i32_0 = arith.constant 0 : i32
    %c0_i32_1 = arith.constant 0 : i32
    return %c0_i32, %c0_i32_0 : i32, i32
  }
  func.func @transform_2(%arg0: i32) -> (i32, i32) {
    %c0_i32 = arith.constant 0 : i32
    %c0_i32_0 = arith.constant 0 : i32
    %c0_i32_1 = arith.constant 0 : i32
    return %c0_i32, %c0_i32_0 : i32, i32
  }
  func.func @transform_3(%arg0: i32) -> (i32, i32) {
    %c0_i32 = arith.constant 0 : i32
    %c0_i32_0 = arith.constant 0 : i32
    %c0_i32_1 = arith.constant 0 : i32
    return %c0_i32, %c0_i32_0 : i32, i32
  }
  func.func @transform_4(%arg0: i32) -> (i32, i32) {
    %c0_i32 = arith.constant 0 : i32
    %c0_i32_0 = arith.constant 0 : i32
    %c0_i32_1 = arith.constant 0 : i32
    return %c0_i32, %c0_i32_0 : i32, i32
  }
  func.func @transform_5(%arg0: i32) -> (i32, i32) {
    %c0_i32 = arith.constant 0 : i32
    %c0_i32_0 = arith.constant 0 : i32
    %c0_i32_1 = arith.constant 0 : i32
    return %c0_i32, %c0_i32_0 : i32, i32
  }
  func.func @transform_6(%arg0: i32) -> (i32, i32) {
    %c0_i32 = arith.constant 0 : i32
    %c0_i32_0 = arith.constant 0 : i32
    %c0_i32_1 = arith.constant 0 : i32
    return %c0_i32, %c0_i32_0 : i32, i32
  }
  func.func @transform_7(%arg0: i32) -> (i32, i32) {
    %c0_i32 = arith.constant 0 : i32
    %c0_i32_0 = arith.constant 0 : i32
    %c0_i32_1 = arith.constant 0 : i32
    return %c0_i32, %c0_i32_0 : i32, i32
  }
  func.func @transform_8(%arg0: i32) -> (i32, i32) {
    %c0_i32 = arith.constant 0 : i32
    %c0_i32_0 = arith.constant 0 : i32
    %c0_i32_1 = arith.constant 0 : i32
    return %c0_i32, %c0_i32_0 : i32, i32
  }
  func.func @transform_9(%arg0: i32) -> (i32, i32) {
    %c0_i32 = arith.constant 0 : i32
    %c0_i32_0 = arith.constant 0 : i32
    %c0_i32_1 = arith.constant 0 : i32
    return %c0_i32, %c0_i32_0 : i32, i32
  }
  func.func @transform_10(%arg0: i32) -> (i32, i32) {
    %c0_i32 = arith.constant 0 : i32
    %c0_i32_0 = arith.constant 0 : i32
    %c0_i32_1 = arith.constant 0 : i32
    return %c0_i32, %c0_i32_0 : i32, i32
  }
  func.func @transform_11(%arg0: i32) -> (i32, i32) {
    %c0_i32 = arith.constant 0 : i32
    %c0_i32_0 = arith.constant 0 : i32
    return %arg0, %c0_i32 : i32, i32
  }
}

</mosaic_0001>

<bundles_post_ra>
// kernel: encoder_network_forward.1
= control target key start
LH: loop header
LB: loop body
LE: loop exit
PB: predicated region body
PF: predicated region fallthrough
CT: control target
= control target key end

     0   :  { %vm49_vm0 = vcmask 64512   ;;  %v949_v0 = vmov 0.0   ;;  %vm950_vm1 = vmmov 0   ;;  %v951_v5 = vmov 0.0|0.0   ;;  %s1237_s1 = inlined_call_operand.vmem [shape: f32[8,80], index: 1, kind: input, shape index: {}]   ;;  %s1238_s0 = inlined_call_operand.vmem [shape: f32[24,8], index: 0, kind: input, shape index: {}]   ;;  %s1239_s3 = inlined_call_operand.vmem [shape: f32[80,64], index: 3, kind: input, shape index: {}]   ;;  %s1240_s5 = inlined_call_operand.vmem [shape: f32[64,32], index: 5, kind: input, shape index: {}]   ;;  %s1241_s2 = inlined_call_operand.vmem [shape: f32[1,80], index: 2, kind: input, shape index: {}]   ;;  %s1242_s9 = inlined_call_operand.vmem [shape: f32[80,128], index: 9, kind: input, shape index: {}]   ;;  %s1243_s4 = inlined_call_operand.vmem [shape: f32[1,64], index: 4, kind: input, shape index: {}]   ;;  %s1244_s8 = inlined_call_operand.vmem [shape: f32[64,128], index: 8, kind: input, shape index: {}]   ;;  %s1245_s7 = inlined_call_operand.vmem [shape: f32[32,128], index: 7, kind: input, shape index: {}]   ;;  %s1246_s6 = inlined_call_operand.vmem [shape: f32[1,32], index: 6, kind: input, shape index: {}]   ;;  %s1247_s10 = inlined_call_operand.vmem [shape: f32[1,128], index: 10, kind: input, shape index: {}]   ;;  %s1248_s11 = inlined_call_operand.vmem [shape: f32[24,128], index: 11, kind: output, shape index: {}]  }
   0x1   :  { %744 = vmatprep.subr.mxu1 %v949_v0  ;;  %v41_v1 = vld [vmem:[%s1237_s1] sm:$0xff]  ;;  %746 = vmatprep.mubr.msk.f32.mxu1 %vm950_vm1, %v949_v0  ;;  %v143_v4 = vld [vmem:[%s1239_s3 + $0x8] sm:$0xff]  ;;  %v144_v7 = vld [vmem:[%s1239_s3 + $0x10] sm:$0xff]  ;;  %vm159_vm2 = vcmask 654336   ;;  %vm267_vm3 = vcmask 523264   ;;  %vm452_vm4 = vcmask 261120  }
   0x2   :  { %v38_v2 = vld [vmem:[%s1238_s0] sm:$0xff]  ;;  %745 = vmatpush3.msra.mxu1 %v41_v1  ;;  %895 = vmatprep.subr.bf16.mxu0 %v951_v5  ;;  %v145_v8 = vld [vmem:[%s1239_s3 + $0x18] sm:$0xff]  ;;  %v39_v9 = vld [vmem:[%s1238_s0 + $0x8] sm:$0xff] }
   0x3   :  { %v142_v3 = vld [vmem:[%s1239_s3] sm:$0xff]  ;;  %747 = vmatmul.mubr.msk.f32.vlgmr.msra.gmra.mrb[0].mxu1 %vm49_vm0, %v38_v2  ;;  %880 = vmatprep.subr.bf16.mxu1 %v951_v5  ;;  %v884_v10 = vpack.c.bf16 %v145_v8, %v144_v7  ;;  %v147_v12 = vld [vmem:[%s1239_s3 + $0x28] sm:$0xff]  ;;  %v40_v13 = vld [vmem:[%s1238_s0 + $0x10] sm:$0xff] }
   0x4   :  { %v881_v6 = vpack.c.bf16 %v143_v4, %v142_v3  ;;  %749 = vmatprep.mubr.msk.f32.mxu1 %vm950_vm1, %v949_v0  ;;  %800 = vmatprep.mubr.msk.f32.mxu0 %vm950_vm1, %v949_v0  ;;  %v146_v11 = vld [vmem:[%s1239_s3 + $0x20] sm:$0xff]  ;;  %v148_v15 = vld [vmem:[%s1239_s3 + $0x30] sm:$0xff]  ;;  %v149_v16 = vld [vmem:[%s1239_s3 + $0x38] sm:$0xff] }
   0x5   :  { %v887_v14 = vpack.c.bf16 %v147_v12, %v146_v11  ;;  %v890_v17 = vpack.c.bf16 %v149_v16, %v148_v15  ;;  %v150_v18 = vld [vmem:[%s1239_s3 + $0x40] sm:$0xff]  ;;  %v151_v19 = vld [vmem:[%s1239_s3 + $0x48] sm:$0xff]  ;;  %v254_v23 = vld [vmem:[%s1240_s5 + $0x10] sm:$0xff] }
   0x6   :  { %882 = vmatpush3.bf16.msra.mxu1 %v881_v6  ;;  %v893_v20 = vpack.c.bf16 %v151_v19, %v150_v18  ;;  %v252_v21 = vld [vmem:[%s1240_s5] sm:$0xff]  ;;  %v253_v22 = vld [vmem:[%s1240_s5 + $0x8] sm:$0xff]  ;;  %v255_v25 = vld [vmem:[%s1240_s5 + $0x18] sm:$0xff] }
   0x7   :  { %883 = vmatprep.subr.bf16.mxu1 %v951_v5  ;;  %750 = vmatmul.mubr.msk.f32.gmra.mrb[2].mxu1 %vm49_vm0, %v39_v9  ;;  %v896_v24 = vpack.c.bf16 %v253_v22, %v252_v21  ;;  %v899_v26 = vpack.c.bf16 %v255_v25, %v254_v23  ;;  %v256_v27 = vld [vmem:[%s1240_s5 + $0x20] sm:$0xff]  ;;  %v257_v28 = vld [vmem:[%s1240_s5 + $0x28] sm:$0xff]  ;;  %v544_v38 = vld [vmem:[%s1242_s9 + $0x10] sm:$0xff] }
   0x8   :  { %752 = vmatprep.mubr.msk.f32.mxu1 %vm950_vm1, %v949_v0  ;;  %v902_v29 = vpack.c.bf16 %v257_v28, %v256_v27  ;;  %v663_v30 = vld [vmem:[%s1241_s2] ss:$0 sm:$0xff]  ;;  %v543_v32 = vld [vmem:[%s1242_s9 + $0x8] sm:$0xff]  ;;  %v545_v39 = vld [vmem:[%s1242_s9 + $0x18] sm:$0xff] }
   0x9   :  { %897 = vmatpush3.bf16.msra.mxu0 %v896_v24  ;;  %v542_v31 = vld [vmem:[%s1242_s9] sm:$0xff]  ;;  %v929_v43 = vpack.c.bf16 %v545_v39, %v544_v38  ;;  %v547_v46 = vld [vmem:[%s1242_s9 + $0x28] sm:$0xff]  ;;  %v548_v52 = vld [vmem:[%s1242_s9 + $0x30] sm:$0xff] }
   0xa   :  { %885 = vmatpush3.bf16.msra.mxu1 %v884_v10  ;;  %898 = vmatprep.subr.bf16.mxu0 %v951_v5  ;;  %v926_v36 = vpack.c.bf16 %v543_v32, %v542_v31  ;;  %v546_v45 = vld [vmem:[%s1242_s9 + $0x20] sm:$0xff]  ;;  %v549_v53 = vld [vmem:[%s1242_s9 + $0x38] sm:$0xff]  ;;  %v551_v56 = vld [vmem:[%s1242_s9 + $0x48] sm:$0xff] }
   0xb   :  { %886 = vmatprep.subr.bf16.mxu1 %v951_v5  ;;  %753 = vmatmul.mubr.msk.f32.gmra.mrb[4].mxu1 %vm49_vm0, %v40_v13  ;;  %v932_v50 = vpack.c.bf16 %v547_v46, %v546_v45  ;;  %v935_v54 = vpack.c.bf16 %v549_v53, %v548_v52  ;;  %v550_v55 = vld [vmem:[%s1242_s9 + $0x40] sm:$0xff]  ;;  %v258_v58 = vld [vmem:[%s1240_s5 + $0x30] sm:$0xff]  ;;  %v259_v59 = vld [vmem:[%s1240_s5 + $0x38] sm:$0xff] }
   0xc   :  { %775 = vmatprep.mubr.msk.f32.mxu1 %vm950_vm1, %v949_v0  ;;  %v938_v57 = vpack.c.bf16 %v551_v56, %v550_v55  ;;  %v905_v60 = vpack.c.bf16 %v259_v59, %v258_v58  ;;  %v667_v61 = vld [vmem:[%s1243_s4] ss:$0 sm:$0xff]  ;;  %v365_v63 = vld [vmem:[%s1244_s8 + $0x8] sm:$0xff]  ;;  %v366_v7 = vld [vmem:[%s1244_s8 + $0x10] sm:$0xff]  ;;  %v645_v59 = vlaneseq }
   0xd   :  { %900 = vmatpush3.bf16.msra.mxu0 %v899_v26  ;;  %v364_v62 = vld [vmem:[%s1244_s8] sm:$0xff]  ;;  %v367_v8 = vld [vmem:[%s1244_s8 + $0x18] sm:$0xff]  ;;  %v369_v15 = vld [vmem:[%s1244_s8 + $0x28] sm:$0xff] }
   0xe   :  { %888 = vmatpush3.bf16.msra.mxu1 %v887_v14  ;;  %901 = vmatprep.subr.bf16.mxu0 %v951_v5  ;;  %v908_v4 = vpack.c.bf16 %v365_v63, %v364_v62  ;;  %v911_v12 = vpack.c.bf16 %v367_v8, %v366_v7  ;;  %v368_v14 = vld [vmem:[%s1244_s8 + $0x20] sm:$0xff]  ;;  %v370_v21 = vld [vmem:[%s1244_s8 + $0x30] sm:$0xff]  ;;  %v371_v22 = vld [vmem:[%s1244_s8 + $0x38] sm:$0xff] }
   0xf   :  { %889 = vmatprep.subr.bf16.mxu1 %v951_v5  ;;  %v914_v19 = vpack.c.bf16 %v369_v15, %v368_v14  ;;  %v917_v23 = vpack.c.bf16 %v371_v22, %v370_v21  ;;  %v360_v24 = vld [vmem:[%s1245_s7] sm:$0xff]  ;;  %v361_v25 = vld [vmem:[%s1245_s7 + $0x8] sm:$0xff]  ;;  %v362_v27 = vld [vmem:[%s1245_s7 + $0x10] sm:$0xff] }
  0x10   :  { %v920_v26 = vpack.c.bf16 %v361_v25, %v360_v24  ;;  %v363_v28 = vld [vmem:[%s1245_s7 + $0x18] sm:$0xff] }
  0x11   :  { %903 = vmatpush3.bf16.msra.mxu0 %v902_v29  ;;  %v923_v31 = vpack.c.bf16 %v363_v28, %v362_v27 }
  0x12   :  { %891 = vmatpush3.bf16.msra.mxu1 %v890_v17  ;;  %904 = vmatprep.subr.bf16.mxu0 %v951_v5 }
  0x13   :  { %892 = vmatprep.subr.bf16.mxu1 %v951_v5 }
  0x15   :  { %906 = vmatpush3.bf16.msra.mxu0 %v905_v60 }
  0x16   :  { %894 = vmatpush3.bf16.msra.mxu1 %v893_v20  ;;  %907 = vmatprep.subr.bf16.mxu0 %v951_v5 }
  0x17   :  { %925 = vmatprep.subr.bf16.mxu1 %v951_v5 }
  0xd6   :  { %v125_v33 = vpop.f32.mrb[0].mxu1 }
  0xd7   :  { %v126_v34 = vadd.f32 %v663_v30, %v125_v33  ;;  %v748_v35 = vpop.f32.mrb[1].mxu1 }
  0xd9   :  { %v139_v37 = vmax.f32 %v126_v34, 0.0 }
  0xda   :  { %v130_v40 = vpop.f32.mrb[2].mxu1 }
  0xdb   :  { %v131_v41 = vadd.f32 %v663_v30, %v130_v40  ;;  %v751_v42 = vpop.f32.mrb[3].mxu1  ;;  %776 = vmatmul.mubr.msk.f32.vlgmr.msra.gmra.mrb[6].mxu1 %vm159_vm2, %v139_v37 }
  0xdc   :  { %927 = vmatpush3.bf16.msra.mxu1 %v926_v36  ;;  %778 = vmatprep.mubr.msk.f32.mxu1 %vm950_vm1, %v949_v0  ;;  %v671_v36 = vld [vmem:[%s1246_s6] ss:$0 sm:$0xff] }
  0xdd   :  { %v140_v44 = vmax.f32 %v131_v41, 0.0  ;;  %928 = vmatprep.subr.bf16.mxu1 %v951_v5 }
  0xde   :  { %v135_v47 = vpop.f32.mrb[4].mxu1 }
  0xdf   :  { %v136_v48 = vadd.f32 %v663_v30, %v135_v47  ;;  %v754_v49 = vpop.f32.mrb[5].mxu1  ;;  %779 = vmatmul.mubr.msk.f32.gmra.mrb[8].mxu1 %vm159_vm2, %v140_v44 }
  0xe0   :  { %930 = vmatpush3.bf16.msra.mxu1 %v929_v43  ;;  %781 = vmatprep.mubr.msk.f32.mxu1 %vm950_vm1, %v949_v0 }
  0xe1   :  { %v141_v51 = vmax.f32 %v136_v48, 0.0  ;;  %931 = vmatprep.subr.bf16.mxu1 %v951_v5 }
  0xe3   :  { %782 = vmatmul.mubr.msk.f32.gmra.mrb[10].mxu1 %vm159_vm2, %v141_v51 }
  0xe4   :  { %933 = vmatpush3.bf16.msra.mxu1 %v932_v50  ;;  %871 = vmatprep.mubr.msk.f32.mxu1 %vm950_vm1, %v949_v0 }
  0xe5   :  { %934 = vmatprep.subr.bf16.mxu1 %v951_v5 }
  0xe8   :  { %936 = vmatpush3.bf16.msra.mxu1 %v935_v54 }
  0xe9   :  { %937 = vmatprep.subr.bf16.mxu1 %v951_v5 }
  0xec   :  { %939 = vmatpush3.bf16.msra.mxu1 %v938_v57  ;;  %v684_v57 = vld [vmem:[%s1247_s10] ss:$0 sm:$0xff] }
  0xef   :  { %872 = vmatmul.mubr.msk.f32.vlgmr.msra.gmra.mrb[12].mxu1 %vm159_vm2, %v139_v37 }
  0xf0   :  { %874 = vmatprep.mubr.msk.f32.mxu1 %vm950_vm1, %v949_v0 }
  0xf3   :  { %875 = vmatmul.mubr.msk.f32.gmra.mrb[14].mxu1 %vm159_vm2, %v140_v44 }
  0xf4   :  { %877 = vmatprep.mubr.msk.f32.mxu1 %vm950_vm1, %v949_v0 }
  0xf7   :  { %878 = vmatmul.mubr.msk.f32.gmra.mrb[16].mxu1 %vm159_vm2, %v141_v51 }
 0x1ae   :  { %v235_v1 = vpop.f32.mrb[6].mxu1 }
 0x1af   :  { %v236_v2 = vadd.f32 %v667_v61, %v235_v1  ;;  %v777_v3 = vpop.f32.mrb[7].mxu1  ;;  %v646_v1 = vand.u32 127, %v645_v59 }
 0x1b1   :  { %v249_v6 = vmax.f32 %v236_v2, 0.0  ;;  %vm647_vm5 = vcmp.ge.s32.totalorder %v646_v1, 18  ;;  %vm648_vm6 = vcmp.lt.s32.totalorder %v646_v1, 26 }
 0x1b2   :  { %v240_v9 = vpop.f32.mrb[8].mxu1  ;;  %vm649_vm7 = vmand %vm647_vm5, %vm648_vm6 }
 0x1b3   :  { %v241_v10 = vadd.f32 %v667_v61, %v240_v9  ;;  %v780_v11 = vpop.f32.mrb[9].mxu1  ;;  %801 = vmatmul.mubr.msk.f32.vlgmr.msra.gmra.mrb[0].mxu0 %vm267_vm3, %v249_v6 }
 0x1b4   :  { %909 = vmatpush3.bf16.msra.mxu0 %v908_v4  ;;  %803 = vmatprep.mubr.msk.f32.mxu0 %vm950_vm1, %v949_v0 }
 0x1b5   :  { %v250_v13 = vmax.f32 %v241_v10, 0.0  ;;  %910 = vmatprep.subr.bf16.mxu0 %v951_v5 }
 0x1b6   :  { %v245_v16 = vpop.f32.mrb[10].mxu1 }
 0x1b7   :  { %v246_v17 = vadd.f32 %v667_v61, %v245_v16  ;;  %v783_v18 = vpop.f32.mrb[11].mxu1  ;;  %804 = vmatmul.mubr.msk.f32.gmra.mrb[2].mxu0 %vm267_vm3, %v250_v13 }
 0x1b8   :  { %912 = vmatpush3.bf16.msra.mxu0 %v911_v12  ;;  %806 = vmatprep.mubr.msk.f32.mxu0 %vm950_vm1, %v949_v0 }
 0x1b9   :  { %v251_v20 = vmax.f32 %v246_v17, 0.0  ;;  %913 = vmatprep.subr.bf16.mxu0 %v951_v5 }
 0x1bb   :  { %807 = vmatmul.mubr.msk.f32.gmra.mrb[4].mxu0 %vm267_vm3, %v251_v20 }
 0x1bc   :  { %915 = vmatpush3.bf16.msra.mxu0 %v914_v19  ;;  %825 = vmatprep.mubr.msk.f32.mxu0 %vm950_vm1, %v949_v0 }
 0x1bd   :  { %916 = vmatprep.subr.bf16.mxu0 %v951_v5 }
 0x1c0   :  { %918 = vmatpush3.bf16.msra.mxu0 %v917_v23 }
 0x1c1   :  { %919 = vmatprep.subr.bf16.mxu0 %v951_v5 }
 0x1c2   :  { %v618_v29 = vpop.f32.mrb[12].mxu1 }
 0x1c3   :  { %826 = vmatmul.mubr.msk.f32.vlgmr.msra.gmra.mrb[6].mxu0 %vm267_vm3, %v249_v6  ;;  %v873_v30 = vpop.f32.mrb[13].mxu1 }
 0x1c4   :  { %828 = vmatprep.mubr.msk.f32.mxu0 %vm950_vm1, %v949_v0  ;;  %921 = vmatpush3.bf16.msra.mxu0 %v920_v26 }
 0x1c5   :  { %922 = vmatprep.subr.bf16.mxu0 %v951_v5 }
 0x1c6   :  { %v623_v32 = vpop.f32.mrb[14].mxu1 }
 0x1c7   :  { %829 = vmatmul.mubr.msk.f32.gmra.mrb[8].mxu0 %vm267_vm3, %v250_v13  ;;  %v876_v33 = vpop.f32.mrb[15].mxu1 }
 0x1c8   :  { %831 = vmatprep.mubr.msk.f32.mxu0 %vm950_vm1, %v949_v0  ;;  %924 = vmatpush3.bf16.msra.mxu0 %v923_v31 }
 0x1ca   :  { %v628_v34 = vpop.f32.mrb[16].mxu1 }
 0x1cb   :  { %832 = vmatmul.mubr.msk.f32.gmra.mrb[10].mxu0 %vm267_vm3, %v251_v20  ;;  %v879_v35 = vpop.f32.mrb[17].mxu1 }
 0x1cc   :  { %842 = vmatprep.mubr.msk.f32.mxu0 %vm950_vm1, %v949_v0 }
 0x286   :  { %v343_v5 = vpop.f32.mrb[0].mxu0 }
 0x287   :  { %v344_v37 = vadd.f32 %v671_v36, %v343_v5  ;;  %v802_v38 = vpop.f32.mrb[1].mxu0 }
 0x289   :  { %v357_v39 = vmax.f32 %v344_v37, 0.0 }
 0x28a   :  { %v348_v40 = vpop.f32.mrb[2].mxu0 }
 0x28b   :  { %v349_v41 = vadd.f32 %v671_v36, %v348_v40  ;;  %v805_v42 = vpop.f32.mrb[3].mxu0  ;;  %843 = vmatmul.mubr.msk.f32.vlgmr.msra.gmra.mrb[12].mxu0 %vm452_vm4, %v357_v39 }
 0x28c   :  { %845 = vmatprep.mubr.msk.f32.mxu0 %vm950_vm1, %v949_v0 }
 0x28d   :  { %v358_v43 = vmax.f32 %v349_v41, 0.0 }
 0x28e   :  { %v353_v44 = vpop.f32.mrb[4].mxu0 }
 0x28f   :  { %v354_v45 = vadd.f32 %v671_v36, %v353_v44  ;;  %v808_v46 = vpop.f32.mrb[5].mxu0  ;;  %846 = vmatmul.mubr.msk.f32.gmra.mrb[14].mxu0 %vm452_vm4, %v358_v43 }
 0x290   :  { %848 = vmatprep.mubr.msk.f32.mxu0 %vm950_vm1, %v949_v0 }
 0x291   :  { %v359_v47 = vmax.f32 %v354_v45, 0.0 }
 0x293   :  { %849 = vmatmul.mubr.msk.f32.gmra.mrb[16].mxu0 %vm452_vm4, %v359_v47 }
 0x296   :  { %v438_v48 = vpop.f32.mrb[6].mxu0 }
 0x297   :  { %v827_v49 = vpop.f32.mrb[7].mxu0 }
 0x29a   :  { %v443_v50 = vpop.f32.mrb[8].mxu0 }
 0x29b   :  { %v830_v51 = vpop.f32.mrb[9].mxu0 }
 0x29e   :  { %v448_v52 = vpop.f32.mrb[10].mxu0 }
 0x29f   :  { %v833_v53 = vpop.f32.mrb[11].mxu0 }
 0x35e   :  { %v528_v54 = vpop.f32.mrb[12].mxu0 }
 0x35f   :  { %v529_v55 = vadd.f32 %v528_v54, %v438_v48  ;;  %v844_v56 = vpop.f32.mrb[13].mxu0 }
 0x361   :  { %v632_v58 = vadd.f32 %v618_v29, %v529_v55 }
 0x362   :  { %v533_v60 = vpop.f32.mrb[14].mxu0 }
 0x363   :  { %v642_v61 = vadd.f32 %v684_v57, %v632_v58  ;;  %v534_v0 = vadd.f32 %v533_v60, %v443_v50  ;;  %v847_v62 = vpop.f32.mrb[15].mxu0 }
 0x365   :  { %943 = vtanh.f32 %v642_v61  ;;  %v633_v63 = vadd.f32 %v623_v32, %v534_v0 }
 0x366   :  { %v538_v2 = vpop.f32.mrb[16].mxu0 }
 0x367   :  { %v643_v3 = vadd.f32 %v684_v57, %v633_v63  ;;  %v539_v4 = vadd.f32 %v538_v2, %v448_v52  ;;  %v850_v6 = vpop.f32.mrb[17].mxu0 }
 0x369   :  { %945 = vtanh.f32 %v643_v3  ;;  %v634_v7 = vadd.f32 %v628_v34, %v539_v4 }
 0x36b   :  { %v644_v8 = vadd.f32 %v684_v57, %v634_v7 }
 0x36d   :  { %947 = vtanh.f32 %v644_v8 }
 0x36f   :  { %v944_v9 = vpop.eup %943 }
 0x370   :  { %v653_v10 = vsel %vm649_vm7, %v944_v9, %v642_v61 }
 0x371   :  { %656 = vst [vmem:[%s1248_s11] sm:$0xff] %v653_v10 }
 0x373   :  { %v946_v11 = vpop.eup %945 }
 0x374   :  { %v654_v12 = vsel %vm649_vm7, %v946_v11, %v643_v3 }
 0x375   :  { %657 = vst [vmem:[%s1248_s11 + $0x8] sm:$0xff] %v654_v12 }
 0x377   :  { %v948_v13 = vpop.eup %947 }
 0x378   :  { %v655_v14 = vsel %vm649_vm7, %v948_v13, %v644_v8 }
 0x379   :  { %658 = vst [vmem:[%s1248_s11 + $0x10] sm:$0xff] %v655_v14 }

</bundles_post_ra>
